<compile_context>
chip_gen: v7x
topology: tpu7x:2x2x1
jax: 0.10.0
libtpu: 0.0.40
codegen_flags: <defaults>
</compile_context>

<pallas_src>
import functools

import jax
import jax.numpy as jnp
from jax.experimental import pallas as pl
from jax.experimental.pallas import tpu as pltpu

D_MODEL = 32
NUM_EXPERTS = 8
TOP_K = 2
TOKEN_TILE = 8192  # max tokens per grid step (tokens live on the lane axis -> multiple of 128)


def _round_up(a, b):
    return (a + b - 1) // b * b


def gating_kernel(x_ref, w_ref, b_ref, out_ref):
    # x_ref:   (TM, D)           token tile (tokens on sublanes, D on lanes)
    # w_ref:   (E, D)            gate weight, as stored by nn.Linear
    # b_ref:   (E, 1)            gate bias
    # out_ref: (E + 2*TOP_K, TM) packed, lane-dense slab:
    #          rows [0:E)        softmax weights (expert-major)
    #          rows [E:E+2)      top-1 / top-2 weights
    #          rows [E+2:E+4)    top-1 / top-2 indices (exact small ints as f32)
    e = w_ref.shape[0]

    # logits^T = W @ x^T -> (E, TM): contract D on both operands so tokens land
    # on the lane axis and every downstream op is lane-dense.  MXU, f32 acc.
    logits_t = jax.lax.dot_general(
        w_ref[...], x_ref[...],
        dimension_numbers=(((1,), (1,)), ((), ())),
        preferred_element_type=jnp.float32,
    )
    logits_t = logits_t + b_ref[...]  # (E, TM) + (E, 1)

    # Numerically stable softmax over experts (sublane axis).
    m = jnp.max(logits_t, axis=0, keepdims=True)   # (1, TM)
    ex = jnp.exp(logits_t - m)
    s = jnp.sum(ex, axis=0, keepdims=True)         # (1, TM)
    # Exact divide on purpose: approx reciprocal would perturb the top-k
    # tie-break / tolerance semantics below.
    weights = ex / s                               # (E, TM)

    # Expert-index iota as (E, 1); broadcasting handles the token (lane) axis.
    iota = jax.lax.broadcasted_iota(jnp.int32, (e, 1), 0)
    big_idx = jnp.int32(e)
    neg_inf = jnp.float32(-jnp.inf)

    # top-1 (ties -> lowest index, matching jax.lax.top_k / torch.topk)
    w1 = jnp.max(weights, axis=0, keepdims=True)                                   # (1, TM)
    i1 = jnp.min(jnp.where(weights == w1, iota, big_idx), axis=0, keepdims=True)   # (1, TM) i32

    # top-2: mask out only the argmax slot
    masked = jnp.where(iota == i1, neg_inf, weights)
    w2 = jnp.max(masked, axis=0, keepdims=True)
    i2 = jnp.min(jnp.where(masked == w2, iota, big_idx), axis=0, keepdims=True)

    # Single wide, lane-dense writeback of the whole packed block.
    out_ref[...] = jnp.concatenate(
        [weights, w1, w2, i1.astype(jnp.float32), i2.astype(jnp.float32)],
        axis=0,
    )


@functools.partial(jax.jit, static_argnames=("token_tile",))
def gating_network(x, w, b, *, token_tile=TOKEN_TILE):
    """x: [N, D], w: [E, D], b: [E].

    Returns (topk_w [N, TOP_K] f32, topk_i [N, TOP_K] i32, weights [N, E] f32).
    """
    n, d = x.shape
    e = w.shape[0]
    pack_w = e + 2 * TOP_K
    # Indices round-trip through f32 lanes of the packed slab; exact only while
    # the expert count fits the f32 mantissa.
    assert e < (1 << 24), "expert indices would not round-trip exactly through f32"

    # Tokens are the lane axis of all intermediates and of the output, so the
    # tile is a multiple of 128.  Large tiles amortize the ~0.35us per-step
    # cost; double-buffered VMEM at tile=8192 is only ~1.4 MiB (x: 1 MiB,
    # out: 384 KiB), far under default limits on all generations.
    tile = min(token_tile, _round_up(max(n, 1), 128))
    n_pad = _round_up(n, tile)
    if n_pad != n:
        # Padded (zero) rows see bias-only logits -> softmax stays finite; the
        # rows are sliced off below and never divide by a masked-out sum.
        x = jnp.pad(x, ((0, n_pad - n), (0, 0)))

    b2d = b.reshape(e, 1)

    packed = pl.pallas_call(
        gating_kernel,
        out_shape=jax.ShapeDtypeStruct((pack_w, n_pad), jnp.float32),
        grid_spec=pltpu.PrefetchScalarGridSpec(
            num_scalar_prefetch=0,
            grid=(n_pad // tile,),
            in_specs=[
                pl.BlockSpec((tile, d), lambda i: (i, 0)),
                pl.BlockSpec((e, d), lambda i: (0, 0)),
                pl.BlockSpec((e, 1), lambda i: (0, 0)),
            ],
            out_specs=pl.BlockSpec((pack_w, tile), lambda i: (0, i)),
        ),
        compiler_params=pltpu.CompilerParams(dimension_semantics=("parallel",)),
    )(x, w, b2d)

    packed = packed[:, :n]
    weights = packed[:e, :].T                                        # (N, E)
    topk_w = packed[e:e + TOP_K, :].T                                # (N, k)
    topk_i = packed[e + TOP_K:e + 2 * TOP_K, :].T.astype(jnp.int32)  # exact round-trip
    return topk_w, topk_i, weights


def _reference(x, w, b):
    logits = x @ w.T + b
    weights = jax.nn.softmax(logits, axis=-1)
    tw, ti = jax.lax.top_k(weights, TOP_K)
    return tw, ti, weights


if __name__ == "__main__":
    key = jax.random.PRNGKey(0)
    k_x, k_w, k_b = jax.random.split(key, 3)

    batch, seq = 2, 8
    # deterministic "nn.Linear(d_model, num_experts)"-shaped parameters
    bound = 1.0 / (D_MODEL ** 0.5)
    w = jax.random.uniform(k_w, (NUM_EXPERTS, D_MODEL), jnp.float32, -bound, bound)
    b = jax.random.uniform(k_b, (NUM_EXPERTS,), jnp.float32, -bound, bound)

    x = jax.random.normal(k_x, (batch, seq, D_MODEL), jnp.float32)
    x_flat = x.reshape(batch * seq, D_MODEL)

    tw, ti, wts = gating_network(x_flat, w, b)
    jax.block_until_ready((tw, ti, wts))

    # sanity check against pure-JAX reference
    tw_ref, ti_ref, wts_ref = _reference(x_flat, w, b)
    assert jnp.allclose(wts, wts_ref, atol=1e-5), "softmax weights mismatch"
    assert jnp.allclose(tw, tw_ref, atol=1e-5), "top-k weights mismatch"
    assert jnp.array_equal(ti, ti_ref.astype(jnp.int32)), "top-k indices mismatch"

    # reshape back to [B, S, ...] if the caller wants the original layout
    tw = tw.reshape(batch, seq, TOP_K)
    ti = ti.reshape(batch, seq, TOP_K)
    wts = wts.reshape(batch, seq, NUM_EXPERTS)

    print("KERNEL_OK")
</pallas_src>

<mosaic_0001>
module attributes {stable_mosaic.version = 11 : i64} {
  func.func @gating_kernel(%arg0: i32, %arg1: memref<128x32xf32, #tpu.memory_space<vmem>>, %arg2: memref<8x32xf32, #tpu.memory_space<vmem>>, %arg3: memref<8x1xf32, #tpu.memory_space<vmem>>, %arg4: memref<12x128xf32, #tpu.memory_space<vmem>>) attributes {dimension_semantics = [#tpu.dimension_semantics<parallel>], iteration_bounds = array<i64: 1>, scalar_prefetch = 0 : i64, scratch_operands = 0 : i64, tpu.core_type = #tpu.core_type<tc>, window_params = [{transform_indices = @transform_0, window_bounds = array<i64: 128, 32>}, {pipeline_mode = #tpu.pipeline_mode<synchronous>, transform_indices = @transform_1, window_bounds = array<i64: 8, 32>}, {pipeline_mode = #tpu.pipeline_mode<synchronous>, transform_indices = @transform_2, window_bounds = array<i64: 8, 1>}, {transform_indices = @transform_3, window_bounds = array<i64: 12, 128>}]} {
    %c0 = arith.constant 0 : index
    %c0_0 = arith.constant 0 : index
    %0 = vector.load %arg2[%c0, %c0_0] : memref<8x32xf32, #tpu.memory_space<vmem>>, vector<8x32xf32>
    %c0_1 = arith.constant 0 : index
    %c0_2 = arith.constant 0 : index
    %1 = vector.load %arg1[%c0_1, %c0_2] : memref<128x32xf32, #tpu.memory_space<vmem>>, vector<128x32xf32>
    %cst = arith.constant dense<0.000000e+00> : vector<8x128xf32>
    %2 = tpu.matmul %0, %1, %cst {dimension_numbers = #tpu.dot_dimension_numbers<[1], [1], [0], [0], [0, 0, 1, 0], [], []>} : vector<8x32xf32>, vector<128x32xf32>, vector<8x128xf32> -> vector<8x128xf32>
    %c0_3 = arith.constant 0 : index
    %c0_4 = arith.constant 0 : index
    %3 = vector.load %arg3[%c0_3, %c0_4] : memref<8x1xf32, #tpu.memory_space<vmem>>, vector<8x1xf32>
    %4 = vector.broadcast %3 : vector<8x1xf32> to vector<8x128xf32>
    %5 = arith.addf %2, %4 : vector<8x128xf32>
    %cst_5 = arith.constant dense<0xFF800000> : vector<128xf32>
    %6 = vector.multi_reduction <maximumf>, %5, %cst_5 [0] : vector<8x128xf32> to vector<128xf32>
    %7 = vector.shape_cast %6 : vector<128xf32> to vector<1x128xf32>
    %8 = vector.broadcast %7 : vector<1x128xf32> to vector<8x128xf32>
    %9 = arith.subf %5, %8 : vector<8x128xf32>
    %10 = math.exp %9 : vector<8x128xf32>
    %cst_6 = arith.constant dense<0.000000e+00> : vector<128xf32>
    %11 = vector.multi_reduction <add>, %10, %cst_6 [0] : vector<8x128xf32> to vector<128xf32>
    %12 = vector.shape_cast %11 : vector<128xf32> to vector<1x128xf32>
    %13 = vector.broadcast %12 : vector<1x128xf32> to vector<8x128xf32>
    %14 = arith.divf %10, %13 : vector<8x128xf32>
    %15 = tpu.iota {dimensions = array<i32: 0>} : vector<8x1xi32>
    %cst_7 = arith.constant dense<0xFF800000> : vector<128xf32>
    %16 = vector.multi_reduction <maximumf>, %14, %cst_7 [0] : vector<8x128xf32> to vector<128xf32>
    %17 = vector.shape_cast %16 : vector<128xf32> to vector<1x128xf32>
    %18 = vector.broadcast %17 : vector<1x128xf32> to vector<8x128xf32>
    %19 = arith.cmpf oeq, %14, %18 : vector<8x128xf32>
    %c8_i32 = arith.constant 8 : i32
    %20 = vector.shape_cast %15 : vector<8x1xi32> to vector<8x1xi32>
    %21 = vector.broadcast %20 : vector<8x1xi32> to vector<8x128xi32>
    %22 = vector.broadcast %c8_i32 : i32 to vector<8x128xi32>
    %23 = arith.select %19, %21, %22 : vector<8x128xi1>, vector<8x128xi32>
    %cst_8 = arith.constant dense<2147483647> : vector<128xi32>
    %24 = vector.multi_reduction <minsi>, %23, %cst_8 [0] : vector<8x128xi32> to vector<128xi32>
    %25 = vector.shape_cast %24 : vector<128xi32> to vector<1x128xi32>
    %26 = vector.broadcast %15 : vector<8x1xi32> to vector<8x128xi32>
    %27 = vector.broadcast %25 : vector<1x128xi32> to vector<8x128xi32>
    %28 = arith.cmpi eq, %26, %27 : vector<8x128xi32>
    %cst_9 = arith.constant 0xFF800000 : f32
    %29 = vector.broadcast %cst_9 : f32 to vector<8x128xf32>
    %30 = arith.select %28, %29, %14 : vector<8x128xi1>, vector<8x128xf32>
    %cst_10 = arith.constant dense<0xFF800000> : vector<128xf32>
    %31 = vector.multi_reduction <maximumf>, %30, %cst_10 [0] : vector<8x128xf32> to vector<128xf32>
    %32 = vector.shape_cast %31 : vector<128xf32> to vector<1x128xf32>
    %33 = vector.broadcast %32 : vector<1x128xf32> to vector<8x128xf32>
    %34 = arith.cmpf oeq, %30, %33 : vector<8x128xf32>
    %c8_i32_11 = arith.constant 8 : i32
    %35 = vector.shape_cast %15 : vector<8x1xi32> to vector<8x1xi32>
    %36 = vector.broadcast %35 : vector<8x1xi32> to vector<8x128xi32>
    %37 = vector.broadcast %c8_i32_11 : i32 to vector<8x128xi32>
    %38 = arith.select %34, %36, %37 : vector<8x128xi1>, vector<8x128xi32>
    %cst_12 = arith.constant dense<2147483647> : vector<128xi32>
    %39 = vector.multi_reduction <minsi>, %38, %cst_12 [0] : vector<8x128xi32> to vector<128xi32>
    %40 = vector.shape_cast %39 : vector<128xi32> to vector<1x128xi32>
    %41 = arith.sitofp %25 : vector<1x128xi32> to vector<1x128xf32>
    %42 = arith.sitofp %40 : vector<1x128xi32> to vector<1x128xf32>
    %43 = tpu.concatenate %14, %17, %32, %41, %42 in 0 : vector<8x128xf32>, vector<1x128xf32>, vector<1x128xf32>, vector<1x128xf32>, vector<1x128xf32> -> vector<12x128xf32>
    %c0_13 = arith.constant 0 : index
    %c0_14 = arith.constant 0 : index
    %44 = vector.load %arg4[%c0_13, %c0_14] : memref<12x128xf32, #tpu.memory_space<vmem>>, vector<12x128xf32>
    tpu.vector_store %arg4[%c0_13, %c0_14], %43 {strides = array<i32>} : memref<12x128xf32, #tpu.memory_space<vmem>>, vector<12x128xf32>,
    return
  }
  func.func @transform_0(%arg0: i32) -> (i32, i32) {
    %c0_i32 = arith.constant 0 : i32
    %c0_i32_0 = arith.constant 0 : i32
    return %arg0, %c0_i32 : i32, i32
  }
  func.func @transform_1(%arg0: i32) -> (i32, i32) {
    %c0_i32 = arith.constant 0 : i32
    %c0_i32_0 = arith.constant 0 : i32
    %c0_i32_1 = arith.constant 0 : i32
    return %c0_i32, %c0_i32_0 : i32, i32
  }
  func.func @transform_2(%arg0: i32) -> (i32, i32) {
    %c0_i32 = arith.constant 0 : i32
    %c0_i32_0 = arith.constant 0 : i32
    %c0_i32_1 = arith.constant 0 : i32
    return %c0_i32, %c0_i32_0 : i32, i32
  }
  func.func @transform_3(%arg0: i32) -> (i32, i32) {
    %c0_i32 = arith.constant 0 : i32
    %c0_i32_0 = arith.constant 0 : i32
    return %c0_i32, %arg0 : i32, i32
  }
}

</mosaic_0001>

<bundles_post_ra>
// kernel: gating_network.1
= control target key start
LH: loop header
LB: loop body
LE: loop exit
PB: predicated region body
PF: predicated region fallthrough
CT: control target
= control target key end

     0   :  { %vm37_vm0 = vcmask 261120   ;;  %v338_v0 = vmov 0.0|0.0   ;;  %vm339_vm2 = vmmov 0   ;;  %v340_v4 = vmov 0.0   ;;  %s445_s0 = inlined_call_operand.vmem [shape: f32[128,32], index: 0, kind: input, shape index: {}]   ;;  %s446_s2 = inlined_call_operand.vmem [shape: f32[8,1], index: 2, kind: input, shape index: {}]   ;;  %s447_s1 = inlined_call_operand.vmem [shape: f32[8,32], index: 1, kind: input, shape index: {}]   ;;  %s448_s3 = inlined_call_operand.vmem [shape: f32[12,128], index: 3, kind: output, shape index: {}]  }
   0x1   :  { %297 = vmatprep.subr.bf16.mxu0 %v338_v0  ;;  %v15_v1 = vld [vmem:[%s445_s0] sm:$0xff]  ;;  %v16_v2 = vld [vmem:[%s445_s0 + $0x8] sm:$0xff]  ;;  %vm370_vm1 = vmpackc.low %vm37_vm0, %vm37_vm0  ;;  %294 = vmatprep.mubr.msk.f32.mxu0 %vm339_vm2, %v340_v4  ;;  %v341_v6 = vmov 0   ;;  %v176_v54 = vlaneseq  ;;  %vm216_vm11 = vcmask 1040384   ;;  %vm218_vm13 = vcmask 1041408  }
   0x2   :  { %v298_v5 = vpack.c.bf16 %v16_v2, %v15_v1  ;;  %333 = vset.pattern.permute.xlu0 %v341_v6  ;;  %v17_v7 = vld [vmem:[%s445_s0 + $0x10] sm:$0xff]  ;;  %v18_v8 = vld [vmem:[%s445_s0 + $0x18] sm:$0xff]  ;;  %v31_v9 = vld [vmem:[%s446_s2] sm:$0xff]  ;;  %vm220_vm14 = vcmask 1042432  }
   0x3   :  { %v302_v10 = vpack.c.bf16 %v18_v8, %v17_v7  ;;  %34 = vperm.xlu0 %333, %v31_v9   ;;  %v19_v11 = vld [vmem:[%s445_s0 + $0x20] sm:$0xff]  ;;  %v20_v12 = vld [vmem:[%s445_s0 + $0x28] sm:$0xff]  ;;  %v21_v14 = vld [vmem:[%s445_s0 + $0x30] sm:$0xff]  ;;  %v177_v57 = vshrl.u32 %v176_v54, 7 }
   0x4   :  { %300 = vmatpush3.bf16.xpose.msk.msra.mxu0 %vm370_vm1, %v298_v5  ;;  %v306_v13 = vpack.c.bf16 %v20_v12, %v19_v11  ;;  %v22_v15 = vld [vmem:[%s445_s0 + $0x38] sm:$0xff]  ;;  %v23_v17 = vld [vmem:[%s445_s0 + $0x40] sm:$0xff]  ;;  %v24_v18 = vld [vmem:[%s445_s0 + $0x48] sm:$0xff] }
   0x5   :  { %301 = vmatprep.subr.bf16.mxu0 %v338_v0  ;;  %v310_v16 = vpack.c.bf16 %v22_v15, %v21_v14  ;;  %v314_v19 = vpack.c.bf16 %v24_v18, %v23_v17  ;;  %v25_v20 = vld [vmem:[%s445_s0 + $0x50] sm:$0xff]  ;;  %v26_v21 = vld [vmem:[%s445_s0 + $0x58] sm:$0xff]  ;;  %v27_v23 = vld [vmem:[%s445_s0 + $0x60] sm:$0xff] }
   0x6   :  { %v318_v22 = vpack.c.bf16 %v26_v21, %v25_v20  ;;  %v28_v24 = vld [vmem:[%s445_s0 + $0x68] sm:$0xff]  ;;  %v29_v26 = vld [vmem:[%s445_s0 + $0x70] sm:$0xff]  ;;  %v30_v27 = vld [vmem:[%s445_s0 + $0x78] sm:$0xff] }
   0x7   :  { %v322_v25 = vpack.c.bf16 %v28_v24, %v27_v23  ;;  %v326_v28 = vpack.c.bf16 %v30_v27, %v29_v26  ;;  %v14_v29 = vld [vmem:[%s447_s1] sm:$0xff] }
   0xc   :  { %304 = vmatpush3.bf16.xpose.msk.msra.mxu0 %vm370_vm1, %v302_v10 }
   0xd   :  { %305 = vmatprep.subr.bf16.mxu0 %v338_v0 }
  0x14   :  { %308 = vmatpush3.bf16.xpose.msk.msra.mxu0 %vm370_vm1, %v306_v13 }
  0x15   :  { %309 = vmatprep.subr.bf16.mxu0 %v338_v0 }
  0x1c   :  { %312 = vmatpush3.bf16.xpose.msk.msra.mxu0 %vm370_vm1, %v310_v16 }
  0x1d   :  { %313 = vmatprep.subr.bf16.mxu0 %v338_v0 }
  0x24   :  { %316 = vmatpush3.bf16.xpose.msk.msra.mxu0 %vm370_vm1, %v314_v19 }
  0x25   :  { %317 = vmatprep.subr.bf16.mxu0 %v338_v0 }
  0x2c   :  { %320 = vmatpush3.bf16.xpose.msk.msra.mxu0 %vm370_vm1, %v318_v22 }
  0x2d   :  { %321 = vmatprep.subr.bf16.mxu0 %v338_v0 }
  0x34   :  { %324 = vmatpush3.bf16.xpose.msk.msra.mxu0 %vm370_vm1, %v322_v25 }
  0x35   :  { %325 = vmatprep.subr.bf16.mxu0 %v338_v0 }
  0x3c   :  { %328 = vmatpush3.bf16.xpose.msk.msra.mxu0 %vm370_vm1, %v326_v28 }
  0x43   :  { %295 = vmatmul.mubr.msk.f32.vlgmr.msra.gmra.mrb[0].mxu0 %vm37_vm0, %v14_v29 }
  0x82   :  { %v35_v30 = vpop.permute.xlu0 %34 }
 0x116   :  { %v155_v31 = vpop.f32.mrb[0].mxu0 }
 0x117   :  { %v156_v32 = vadd.f32 %v155_v31, %v35_v30  ;;  %v296_v33 = vpop.f32.mrb[1].mxu0 }
 0x119   :  { %v159_v34 = vrot.slane %v156_v32, 4 }
 0x11b   :  { %v160_v35 = vmax.f32 %v156_v32, %v159_v34 }
 0x11d   :  { %v161_v36 = vrot.slane %v160_v35, 2 }
 0x11f   :  { %v162_v37 = vmax.f32 %v160_v35, %v161_v36 }
 0x121   :  { %v163_v38 = vrot.slane %v162_v37, 1 }
 0x123   :  { %v164_v39 = vmax.f32 %v162_v37, %v163_v38 }
 0x125   :  { %v165_v40 = vsub.f32 %v156_v32, %v164_v39 }
 0x127   :  { %v166_v41 = vmul.f32 1.442695, %v165_v40 }
 0x129   :  { %334 = vpow2.f32 %v166_v41 }
 0x133   :  { %v335_v42 = vpop.eup %334 }
 0x134   :  { %v168_v43 = vrot.slane %v335_v42, 4 }
 0x136   :  { %v169_v44 = vadd.f32 %v335_v42, %v168_v43 }
 0x138   :  { %v170_v45 = vrot.slane %v169_v44, 2 }
 0x13a   :  { %v171_v46 = vadd.f32 %v170_v45, %v169_v44 }
 0x13c   :  { %v172_v47 = vrot.slane %v171_v46, 1 }
 0x13e   :  { %v173_v48 = vadd.f32 %v172_v47, %v171_v46 }
 0x140   :  { %336 = vrcp.f32 %v173_v48 }
 0x14a   :  { %v337_v49 = vpop.eup %336 }
 0x14b   :  { %v175_v50 = vmul.f32 %v337_v49, %v335_v42 }
 0x14d   :  { %v178_v51 = vrot.slane %v175_v50, 4  ;;  %222 = vst [vmem:[%s448_s3] sm:$0xff] %v175_v50 }
 0x14f   :  { %v179_v52 = vmax.f32 %v175_v50, %v178_v51 }
 0x151   :  { %v180_v53 = vrot.slane %v179_v52, 2 }
 0x153   :  { %v181_v55 = vmax.f32 %v179_v52, %v180_v53 }
 0x155   :  { %v182_v56 = vrot.slane %v181_v55, 1 }
 0x157   :  { %v183_v58 = vmax.f32 %v181_v55, %v182_v56 }
 0x159   :  { %vm184_vm3 = vcmp.eq.f32.partialorder %v175_v50, %v183_v58 }
 0x15a   :  { %v185_v59 = vsel %vm184_vm3, %v177_v57, 8 }
 0x15b   :  { %v186_v60 = vrot.slane %v185_v59, 4 }
 0x15d   :  { %vm187_vm4 = vcmp.lt.s32.totalorder %v185_v59, %v186_v60 }
 0x15e   :  { %v188_v61 = vsel %vm187_vm4, %v185_v59, %v186_v60 }
 0x15f   :  { %v189_v62 = vrot.slane %v188_v61, 2 }
 0x161   :  { %vm190_vm5 = vcmp.lt.s32.totalorder %v188_v61, %v189_v62 }
 0x162   :  { %v191_v63 = vsel %vm190_vm5, %v188_v61, %v189_v62 }
 0x163   :  { %v192_v0 = vrot.slane %v191_v63, 1 }
 0x165   :  { %vm193_vm6 = vcmp.lt.s32.totalorder %v191_v63, %v192_v0 }
 0x166   :  { %v194_v1 = vsel %vm193_vm6, %v191_v63, %v192_v0 }
 0x167   :  { %vm195_vm7 = vcmp.eq.s32.totalorder %v177_v57, %v194_v1  ;;  %v214_v17 = vcvt.s32.f32 %v194_v1 }
 0x168   :  { %v196_v2 = vsel %vm195_vm7, -inf, %v175_v50 }
 0x169   :  { %v197_v3 = vrot.slane %v196_v2, 4 }
 0x16b   :  { %v198_v4 = vmax.f32 %v196_v2, %v197_v3 }
 0x16d   :  { %v199_v5 = vrot.slane %v198_v4, 2 }
 0x16f   :  { %v200_v6 = vmax.f32 %v198_v4, %v199_v5 }
 0x171   :  { %v201_v7 = vrot.slane %v200_v6, 1 }
 0x173   :  { %v202_v8 = vmax.f32 %v200_v6, %v201_v7 }
 0x175   :  { %vm203_vm8 = vcmp.eq.f32.partialorder %v196_v2, %v202_v8  ;;  %v217_v15 = vsel %vm216_vm11, %v183_v58, %v202_v8 }
 0x176   :  { %v204_v9 = vsel %vm203_vm8, %v177_v57, 8  ;;  %v219_v19 = vsel %vm218_vm13, %v217_v15, %v214_v17 }
 0x177   :  { %v205_v10 = vrot.slane %v204_v9, 4 }
 0x179   :  { %vm206_vm9 = vcmp.lt.s32.totalorder %v204_v9, %v205_v10 }
 0x17a   :  { %v207_v11 = vsel %vm206_vm9, %v204_v9, %v205_v10 }
 0x17b   :  { %v208_v12 = vrot.slane %v207_v11, 2 }
 0x17d   :  { %vm209_vm10 = vcmp.lt.s32.totalorder %v207_v11, %v208_v12 }
 0x17e   :  { %v210_v13 = vsel %vm209_vm10, %v207_v11, %v208_v12 }
 0x17f   :  { %v211_v14 = vrot.slane %v210_v13, 1 }
 0x181   :  { %vm212_vm12 = vcmp.lt.s32.totalorder %v210_v13, %v211_v14 }
 0x182   :  { %v213_v16 = vsel %vm212_vm12, %v210_v13, %v211_v14 }
 0x183   :  { %v215_v18 = vcvt.s32.f32 %v213_v16 }
 0x185   :  { %v221_v20 = vsel %vm220_vm14, %v219_v19, %v215_v18 }
 0x186   :  { %223 = vst [vmem:[%s448_s3 + $0x8] sm:$0xf] %v221_v20 }

</bundles_post_ra>
